<compile_context>
chip_gen: v7x
topology: tpu7x:2x2x1
jax: 0.10.0
libtpu: 0.0.40
codegen_flags: <defaults>
</compile_context>

<pallas_src>
import jax
import jax.numpy as jnp
from jax.experimental import pallas as pl
from jax.experimental.pallas import tpu as pltpu


def _encoder_y_kernel(y_ref, w1_ref, w2_ref, w3_ref, bias_ref, out_ref):
    hidden = w1_ref.shape[1]
    out_dim = w3_ref.shape[1]
    b1 = bias_ref[0:1, :hidden]        # (1, 32)
    b2 = bias_ref[1:2, :hidden]        # (1, 32)
    b3 = bias_ref[2:3, :out_dim]       # (1, 2*w_dim), mu-cols first / logvar-cols second

    # layer 1: Linear(y_dim, 32) + ReLU
    h = jnp.dot(y_ref[...], w1_ref[...], preferred_element_type=jnp.float32) + b1
    h = jnp.maximum(h, 0.0)
    # layer 2: Linear(32, 32) + ReLU
    h = jnp.dot(h, w2_ref[...], preferred_element_type=jnp.float32) + b2
    h = jnp.maximum(h, 0.0)
    # layer 3: Linear(32, 2*w_dim), columns already permuted -> contiguous mu/logvar
    out_ref[...] = (
        jnp.dot(h, w3_ref[...], preferred_element_type=jnp.float32) + b3
    ).astype(out_ref.dtype)


def prepare_encoder_y_params(params):
    """One-time host-side layout plumbing on the (tiny) weights.

    Permutes w3/b3 columns so mu = first w_dim columns and logvar = last w_dim
    columns (reproducing torch's view(-1, w_dim, 2).unbind(-1)), and packs the
    three biases into a single (8, max(hidden, out_dim)) slab.
    """
    w1, b1, w2, b2, w3, b3 = params
    y_dim, hidden = w1.shape
    out_dim = w3.shape[1]              # 2 * w_dim (even by construction)
    w_dim = out_dim // 2

    perm = jnp.concatenate([jnp.arange(0, out_dim, 2), jnp.arange(1, out_dim, 2)])
    w3p = w3[:, perm]
    b3p = b3.reshape(-1)[perm]

    bias_w = max(hidden, out_dim)
    bias = jnp.zeros((8, bias_w), jnp.float32)
    bias = bias.at[0, :hidden].set(b1.reshape(-1))
    bias = bias.at[1, :hidden].set(b2.reshape(-1))
    bias = bias.at[2, :out_dim].set(b3p)

    return {
        "w1": w1, "w2": w2, "w3": w3p, "bias": bias,
        "y_dim": y_dim, "hidden": hidden, "out_dim": out_dim, "w_dim": w_dim,
    }


def _select_batch_tile(batch, batch_tile):
    """Pick (tb, num_tiles): sublane-aligned tiles, even tile count for v7x
    2-TensorCore balance, no host-side padding (edge block is clipped)."""
    if batch <= batch_tile:
        return batch, 1                      # single tile == full array dims (legal)
    num_tiles = -(-batch // batch_tile)      # cdiv
    if num_tiles % 2:
        num_tiles += 1                       # balance across 2 TensorCores on v7x
    tb = -(-batch // num_tiles)
    tb = -(-tb // 8) * 8                     # keep second-to-last dim a multiple of 8
    num_tiles = -(-batch // tb)
    return tb, num_tiles


def encoder_y_forward(y, prepped, *, batch_tile=4096):
    """Fused MLP kernel; returns (mu, logvar) exactly like torch unbind(-1)."""
    batch, y_dim = y.shape
    hidden = prepped["hidden"]
    out_dim = prepped["out_dim"]
    w_dim = prepped["w_dim"]
    bias_w = prepped["bias"].shape[1]

    tb, num_tiles = _select_batch_tile(batch, batch_tile)

    out = pl.pallas_call(
        _encoder_y_kernel,
        out_shape=jax.ShapeDtypeStruct((batch, out_dim), jnp.float32),
        grid=(num_tiles,),
        in_specs=[
            pl.BlockSpec((tb, y_dim), lambda i: (i, 0)),          # batch-tiled input
            pl.BlockSpec((y_dim, hidden), lambda i: (0, 0)),      # VMEM-resident
            pl.BlockSpec((hidden, hidden), lambda i: (0, 0)),     # VMEM-resident
            pl.BlockSpec((hidden, out_dim), lambda i: (0, 0)),    # VMEM-resident
            pl.BlockSpec((8, bias_w), lambda i: (0, 0)),          # packed biases
        ],
        out_specs=pl.BlockSpec((tb, out_dim), lambda i: (i, 0)),
        compiler_params=pltpu.CompilerParams(
            dimension_semantics=("parallel",),
            vmem_limit_bytes=32 * 1024 * 1024,
        ),
    )(y, prepped["w1"], prepped["w2"], prepped["w3"], prepped["bias"])

    # mu/logvar are contiguous because w3/b3 columns were permuted at prep time.
    return out[:, :w_dim], out[:, w_dim:]


def init_params(key, y_dim, w_dim):
    """Deterministic synthetic parameters (PyTorch-Linear-shaped, stored as (in, out))."""
    hidden = 32
    k = jax.random.split(key, 6)
    w1 = jax.random.normal(k[0], (y_dim, hidden), jnp.float32) * 0.1
    b1 = jax.random.normal(k[1], (1, hidden), jnp.float32) * 0.1
    w2 = jax.random.normal(k[2], (hidden, hidden), jnp.float32) * 0.1
    b2 = jax.random.normal(k[3], (1, hidden), jnp.float32) * 0.1
    w3 = jax.random.normal(k[4], (hidden, 2 * w_dim), jnp.float32) * 0.1
    b3 = jax.random.normal(k[5], (1, 2 * w_dim), jnp.float32) * 0.1
    return (w1, b1, w2, b2, w3, b3)


def _reference_forward(y, params):
    """Plain-JAX reference with the original interleaved mu/logvar semantics."""
    w1, b1, w2, b2, w3, b3 = params
    h = jnp.maximum(y @ w1 + b1, 0.0)
    h = jnp.maximum(h @ w2 + b2, 0.0)
    w = h @ w3 + b3
    w3d = w.reshape(y.shape[0], w3.shape[1] // 2, 2)
    return w3d[..., 0], w3d[..., 1]


if __name__ == "__main__":
    key = jax.random.PRNGKey(0)
    y_dim, w_dim = 4, 8

    k_in, k_par, k_big = jax.random.split(key, 3)
    params = init_params(k_par, y_dim, w_dim)
    prepped = prepare_encoder_y_params(params)   # one-time layout prep

    # Small shape (single grid step, tile == full array).
    batch = 8
    y = jax.random.normal(k_in, (batch, y_dim), jnp.float32)
    mu, logvar = encoder_y_forward(y, prepped)
    jax.block_until_ready((mu, logvar))
    mu_ref, logvar_ref = _reference_forward(y, params)
    assert mu.shape == (batch, w_dim) and logvar.shape == (batch, w_dim)
    assert jnp.allclose(mu, mu_ref, atol=1e-5)
    assert jnp.allclose(logvar, logvar_ref, atol=1e-5)

    # Larger, non-multiple batch: exercises the balanced multi-tile grid and
    # edge-block clipping (no host-side pad / slice passes).
    big_batch = 4100
    y_big = jax.random.normal(k_big, (big_batch, y_dim), jnp.float32)
    mu_b, logvar_b = encoder_y_forward(y_big, prepped, batch_tile=2048)
    jax.block_until_ready((mu_b, logvar_b))
    mu_bref, logvar_bref = _reference_forward(y_big, params)
    assert mu_b.shape == (big_batch, w_dim) and logvar_b.shape == (big_batch, w_dim)
    assert jnp.allclose(mu_b, mu_bref, atol=1e-4)
    assert jnp.allclose(logvar_b, logvar_bref, atol=1e-4)

    print("KERNEL_OK")
</pallas_src>

<mosaic_0001>
module attributes {stable_mosaic.version = 11 : i64} {
  func.func @_encoder_y_kernel(%arg0: i32, %arg1: memref<8x4xf32, #tpu.memory_space<vmem>>, %arg2: memref<4x32xf32, #tpu.memory_space<vmem>>, %arg3: memref<32x32xf32, #tpu.memory_space<vmem>>, %arg4: memref<32x16xf32, #tpu.memory_space<vmem>>, %arg5: memref<8x32xf32, #tpu.memory_space<vmem>>, %arg6: memref<8x16xf32, #tpu.memory_space<vmem>>) attributes {dimension_semantics = [#tpu.dimension_semantics<parallel>], iteration_bounds = array<i64: 1>, scalar_prefetch = 0 : i64, scratch_operands = 0 : i64, tpu.core_type = #tpu.core_type<tc>, window_params = [{transform_indices = @transform_0, window_bounds = array<i64: 8, 4>}, {pipeline_mode = #tpu.pipeline_mode<synchronous>, transform_indices = @transform_1, window_bounds = array<i64: 4, 32>}, {pipeline_mode = #tpu.pipeline_mode<synchronous>, transform_indices = @transform_2, window_bounds = array<i64: 32, 32>}, {pipeline_mode = #tpu.pipeline_mode<synchronous>, transform_indices = @transform_3, window_bounds = array<i64: 32, 16>}, {pipeline_mode = #tpu.pipeline_mode<synchronous>, transform_indices = @transform_4, window_bounds = array<i64: 8, 32>}, {transform_indices = @transform_5, window_bounds = array<i64: 8, 16>}]} {
    %c0 = arith.constant 0 : index
    %c0_0 = arith.constant 0 : index
    %0 = vector.load %arg5[%c0, %c0_0] : memref<8x32xf32, #tpu.memory_space<vmem>>, vector<1x32xf32>
    %c1 = arith.constant 1 : index
    %c0_1 = arith.constant 0 : index
    %1 = vector.load %arg5[%c1, %c0_1] : memref<8x32xf32, #tpu.memory_space<vmem>>, vector<1x32xf32>
    %c2 = arith.constant 2 : index
    %c0_2 = arith.constant 0 : index
    %2 = vector.load %arg5[%c2, %c0_2] : memref<8x32xf32, #tpu.memory_space<vmem>>, vector<1x16xf32>
    %c0_3 = arith.constant 0 : index
    %c0_4 = arith.constant 0 : index
    %3 = vector.load %arg1[%c0_3, %c0_4] : memref<8x4xf32, #tpu.memory_space<vmem>>, vector<8x4xf32>
    %c0_5 = arith.constant 0 : index
    %c0_6 = arith.constant 0 : index
    %4 = vector.load %arg2[%c0_5, %c0_6] : memref<4x32xf32, #tpu.memory_space<vmem>>, vector<4x32xf32>
    %cst = arith.constant dense<0.000000e+00> : vector<8x32xf32>
    %5 = tpu.matmul %3, %4, %cst {dimension_numbers = #tpu.dot_dimension_numbers<[1], [0], [0], [1], [0, 0, 1, 1], [], []>} : vector<8x4xf32>, vector<4x32xf32>, vector<8x32xf32> -> vector<8x32xf32>
    %6 = vector.broadcast %0 : vector<1x32xf32> to vector<8x32xf32>
    %7 = arith.addf %5, %6 : vector<8x32xf32>
    %cst_7 = arith.constant 0.000000e+00 : f32
    %8 = vector.broadcast %cst_7 : f32 to vector<8x32xf32>
    %9 = arith.maximumf %7, %8 : vector<8x32xf32>
    %c0_8 = arith.constant 0 : index
    %c0_9 = arith.constant 0 : index
    %10 = vector.load %arg3[%c0_8, %c0_9] : memref<32x32xf32, #tpu.memory_space<vmem>>, vector<32x32xf32>
    %cst_10 = arith.constant dense<0.000000e+00> : vector<8x32xf32>
    %11 = tpu.matmul %9, %10, %cst_10 {dimension_numbers = #tpu.dot_dimension_numbers<[1], [0], [0], [1], [0, 0, 1, 1], [], []>} : vector<8x32xf32>, vector<32x32xf32>, vector<8x32xf32> -> vector<8x32xf32>
    %12 = vector.broadcast %1 : vector<1x32xf32> to vector<8x32xf32>
    %13 = arith.addf %11, %12 : vector<8x32xf32>
    %cst_11 = arith.constant 0.000000e+00 : f32
    %14 = vector.broadcast %cst_11 : f32 to vector<8x32xf32>
    %15 = arith.maximumf %13, %14 : vector<8x32xf32>
    %c0_12 = arith.constant 0 : index
    %c0_13 = arith.constant 0 : index
    %16 = vector.load %arg4[%c0_12, %c0_13] : memref<32x16xf32, #tpu.memory_space<vmem>>, vector<32x16xf32>
    %cst_14 = arith.constant dense<0.000000e+00> : vector<8x16xf32>
    %17 = tpu.matmul %15, %16, %cst_14 {dimension_numbers = #tpu.dot_dimension_numbers<[1], [0], [0], [1], [0, 0, 1, 1], [], []>} : vector<8x32xf32>, vector<32x16xf32>, vector<8x16xf32> -> vector<8x16xf32>
    %18 = vector.broadcast %2 : vector<1x16xf32> to vector<8x16xf32>
    %19 = arith.addf %17, %18 : vector<8x16xf32>
    %c0_15 = arith.constant 0 : index
    %c0_16 = arith.constant 0 : index
    %20 = vector.load %arg6[%c0_15, %c0_16] : memref<8x16xf32, #tpu.memory_space<vmem>>, vector<8x16xf32>
    tpu.vector_store %arg6[%c0_15, %c0_16], %19 {strides = array<i32>} : memref<8x16xf32, #tpu.memory_space<vmem>>, vector<8x16xf32>,
    return
  }
  func.func @transform_0(%arg0: i32) -> (i32, i32) {
    %c0_i32 = arith.constant 0 : i32
    %c0_i32_0 = arith.constant 0 : i32
    return %arg0, %c0_i32 : i32, i32
  }
  func.func @transform_1(%arg0: i32) -> (i32, i32) {
    %c0_i32 = arith.constant 0 : i32
    %c0_i32_0 = arith.constant 0 : i32
    %c0_i32_1 = arith.constant 0 : i32
    return %c0_i32, %c0_i32_0 : i32, i32
  }
  func.func @transform_2(%arg0: i32) -> (i32, i32) {
    %c0_i32 = arith.constant 0 : i32
    %c0_i32_0 = arith.constant 0 : i32
    %c0_i32_1 = arith.constant 0 : i32
    return %c0_i32, %c0_i32_0 : i32, i32
  }
  func.func @transform_3(%arg0: i32) -> (i32, i32) {
    %c0_i32 = arith.constant 0 : i32
    %c0_i32_0 = arith.constant 0 : i32
    %c0_i32_1 = arith.constant 0 : i32
    return %c0_i32, %c0_i32_0 : i32, i32
  }
  func.func @transform_4(%arg0: i32) -> (i32, i32) {
    %c0_i32 = arith.constant 0 : i32
    %c0_i32_0 = arith.constant 0 : i32
    %c0_i32_1 = arith.constant 0 : i32
    return %c0_i32, %c0_i32_0 : i32, i32
  }
  func.func @transform_5(%arg0: i32) -> (i32, i32) {
    %c0_i32 = arith.constant 0 : i32
    %c0_i32_0 = arith.constant 0 : i32
    return %arg0, %c0_i32 : i32, i32
  }
}

</mosaic_0001>

<bundles_post_ra>
// kernel: tpu_custom_call.1
= control target key start
LH: loop header
LB: loop body
LE: loop exit
PB: predicated region body
PF: predicated region fallthrough
CT: control target
= control target key end

     0   :  { %vm34_vm0 = vcmask 1043456   ;;  %v375_v2 = vmov 0.0   ;;  %vm376_vm1 = vmmov 0   ;;  %vm30_vm2 = vcmask 31744   ;;  %s460_s0 = inlined_call_operand.vmem [shape: f32[8,4], index: 0, kind: input, shape index: {}]   ;;  %s461_s1 = inlined_call_operand.vmem [shape: f32[4,32], index: 1, kind: input, shape index: {}]   ;;  %s462_s2 = inlined_call_operand.vmem [shape: f32[32,32], index: 2, kind: input, shape index: {}]   ;;  %s463_s3 = inlined_call_operand.vmem [shape: f32[32,16], index: 3, kind: input, shape index: {}]   ;;  %s464_s4 = inlined_call_operand.vmem [shape: f32[8,32], index: 4, kind: input, shape index: {}]   ;;  %s465_s5 = inlined_call_operand.hbm [shape: f32[8,16], index: 5, kind: output, shape index: {}]  }
   0x1   :  { %v25_v0 = vld [vmem:[%s461_s1] sm:$0xf]  ;;  %308 = vmatprep.subr.mxu0 %v375_v2  ;;  %310 = vmatprep.mubr.msk.f32.mxu0 %vm376_vm1, %v375_v2  ;;  %v110_v4 = vld [vmem:[%s462_s2 + $0x8] sm:$0xff]  ;;  %v377_v5 = vmov 0.0|0.0  }
   0x2   :  { %v24_v1 = vld [vmem:[%s460_s0] sm:$0xff]  ;;  %309 = vmatpush3.msk.msra.mxu0 %vm34_vm0, %v25_v0  ;;  %335 = vmatprep.subr.bf16.mxu1 %v377_v5 }
   0x3   :  { %v109_v3 = vld [vmem:[%s462_s2] sm:$0xff] }
   0x4   :  { %v336_v6 = vpack.c.bf16 %v110_v4, %v109_v3 }
   0x5   :  { %10 = vsyncpa [#allocation3], 0  ;;  %311 = vmatmul.mubr.msk.f32.vlgmr.msra.gmra.mrb[0].mxu0 %vm30_vm2, %v24_v1  ;;  %321 = vmatprep.mubr.msk.f32.mxu1 %vm376_vm1, %v375_v2  ;;  %v111_v7 = vld [vmem:[%s462_s2 + $0x10] sm:$0xff]  ;;  %v112_v8 = vld [vmem:[%s462_s2 + $0x18] sm:$0xff]  ;;  %vm117_vm3 = vcmask 261120   ;;  %s378_s16 = smov [#allocation2]  }
   0x6   :  { %337 = vmatpush3.bf16.msra.mxu1 %v336_v6  ;;  %341 = vmatprep.subr.bf16.mxu0 %v377_v5  ;;  %v339_v9 = vpack.c.bf16 %v112_v8, %v111_v7  ;;  %v192_v10 = vld [vmem:[%s463_s3] sm:$0xff]  ;;  %v193_v11 = vld [vmem:[%s463_s3 + $0x8] sm:$0xff]  ;;  %v194_v18 = vld [vmem:[%s463_s3 + $0x10] sm:$0xff]  ;;  %s281_s17 = sshll.u32 %s378_s16, 4  ;;  %vm273_vm4 = vcmask 130048   ;;  %s282_s17 = int_to_ptr.vmem [resolvable:$true] %s281_s17 }
   0x7   :  { %338 = vmatprep.subr.bf16.mxu1 %v377_v5  ;;  %332 = vmatprep.mubr.msk.f32.mxu0 %vm376_vm1, %v375_v2  ;;  %v342_v12 = vpack.c.bf16 %v193_v11, %v192_v10  ;;  %v289_v13 = vld [vmem:[%s464_s4] ss:$0 sm:$0xff]  ;;  %v195_v19 = vld [vmem:[%s463_s3 + $0x18] sm:$0xff]  ;;  %v292_v21 = vld [vmem:[%s464_s4 + $0x1] ss:$0 sm:$0xff]  ;;  %s351_s3 = scalar_lea.vmem %s282_s17, 128  ;;  %p356_p1 = scmp.lt.s32.totalorder %s282_s17, %s282_s17 }
   0x8   :  { %v345_v20 = vpack.c.bf16 %v195_v19, %v194_v18  ;;  %v294_v26 = vld [vmem:[%s464_s4 + $0x2] ss:$0 sm:$0xff]  ;;  %p352_p0 = scmp.ne.s32.totalorder %s282_s17, %s351_s3  ;;  %p357_p2 = scmp.lt.s32.totalorder %s351_s3, %s351_s3 }
   0x9   :  { %343 = vmatpush3.bf16.msra.mxu0 %v342_v12 }
   0xa   :  { %340 = vmatpush3.bf16.msra.mxu1 %v339_v9  ;;  %344 = vmatprep.subr.bf16.mxu0 %v377_v5  ;;  %p358_p3 = por %p357_p2, %p356_p1 }
   0xc   :  { %p359_p4 = pnand %p358_p3, %p352_p0 }
   0xd   :  { %346 = vmatpush3.bf16.msra.mxu0 %v345_v20 }
  0xd8   :  { %v104_v14 = vpop.f32.mrb[0].mxu0 }
  0xd9   :  { %v105_v15 = vadd.f32 %v289_v13, %v104_v14  ;;  %v312_v16 = vpop.f32.mrb[1].mxu0 }
  0xdb   :  { %v108_v17 = vmax.f32 %v105_v15, 0.0 }
  0xdd   :  { %322 = vmatmul.mubr.msk.f32.vlgmr.msra.gmra.mrb[0].mxu1 %vm117_vm3, %v108_v17 }
 0x1b0   :  { %v187_v22 = vpop.f32.mrb[0].mxu1 }
 0x1b1   :  { %v188_v23 = vadd.f32 %v292_v21, %v187_v22  ;;  %v323_v24 = vpop.f32.mrb[1].mxu1 }
 0x1b3   :  { %v191_v25 = vmax.f32 %v188_v23, 0.0 }
 0x1b5   :  { %333 = vmatmul.mubr.msk.f32.vlgmr.msra.gmra.mrb[2].mxu0 %vm117_vm3, %v191_v25 }
 0x288   :  { %v269_v27 = vpop.f32.mrb[2].mxu0 }
 0x289   :  { %v270_v28 = vadd.f32 %v294_v26, %v269_v27  ;;  %v334_v29 = vpop.f32.mrb[3].mxu0 }
 0x28b   :  { %274 = vst.msk [vmem:[#allocation2] sm:$0xff] %vm273_vm4, %v270_v28 }
 0x28c   :  { %362 = shalt.err (!%p359_p4)
}
 0x28d   :  { %s363_s20 = scalar_lea.hbm %s465_s5, 128 }
 0x28e   :  { %p364_p5 = scmp.ne.s32.totalorder %s465_s5, %s363_s20  ;;  %p367_p6 = scmp.lt.u32.totalorder %s363_s20, %s465_s5 }
 0x290   :  { %p369_p7 = pnand %p367_p6, %p364_p5 }
 0x292   :  { %372 = shalt.err (!%p369_p7)
}
 0x293   :  { %284 = dma.vmem_to_hbm [thread:$0]  %s282_s17, 128, %s465_s5, [#allocation3]  }
 0x294   :  { %373 = dma.done.wait [#allocation3], 128  }
 0x295   :  { %374 = vsyncadd [#allocation3], 4294967168 }
 0x296   :  { %288 = vsyncpa [#allocation3], 1 }

</bundles_post_ra>
